<compile_context>
chip_gen: v5e
topology: v5e:2x2
jax: 0.10.0
libtpu: 0.0.40
codegen_flags: <defaults>
</compile_context>

<pallas_src>
import jax
import jax.numpy as jnp
from jax.experimental import pallas as pl
from jax.experimental.pallas import tpu as pltpu

_LANE = 128


def icnn2_kernel(y_ref, w_ref, b_ref, out_ref):
    y = y_ref[...]                      # (1, TB)   batch on lanes
    w = w_ref[...]                      # (H, 1)    fused weight column
    b = b_ref[...]                      # (H, 1)    fused bias column

    # Fused pre-activation: (H,1) * (1,TB) + (H,1) -> (H, TB)   (VPU only)
    x = w * y + b

    # Numerically stable softplus with a single exp (EUP) per element.
    z = jnp.maximum(x, 0.0) + jnp.log1p(jnp.exp(-jnp.abs(x)))

    # Hidden-axis reduction = sublane reduce; output stays lane-dense.
    out_ref[...] = jnp.sum(z, axis=0, keepdims=True)    # (1, TB)


def icnn2_forward(y, W0, b0, W1, Wy1, by1, *, tb_max=2048):
    """ICNN2 forward.

    y   : (B, 1) or (B,) float32 input
    W0  : (H, 1)  linear_y0.weight      b0 : (H,)  linear_y0.bias
    W1  : (H, H)  linear_z1.weight (no bias)
    Wy1 : (1, 1)  linear_y1.weight      by1: (1,)  linear_y1.bias
    returns (B,) float32
    """
    y = jnp.asarray(y, jnp.float32).reshape(-1)          # (B,)
    B = y.shape[0]
    H = W0.shape[0]

    # Exact algebraic fusion of all three linears (done once, outside the kernel).
    wtot = (W1.astype(jnp.float32) @ W0.astype(jnp.float32)
            + Wy1.astype(jnp.float32)[0, 0])                       # (H, 1)
    btot = (W1.astype(jnp.float32) @ b0.astype(jnp.float32).reshape(H, 1)
            + by1.astype(jnp.float32)[0])                          # (H, 1)

    # Batch tiling: lane-dense tiles, grid over batch, weights VMEM-resident.
    TB = min(pl.cdiv(B, _LANE) * _LANE, tb_max)
    Bp = pl.cdiv(B, TB) * TB
    y_p = jnp.pad(y, (0, Bp - B)).reshape(1, Bp)                   # (1, Bp)

    out = pl.pallas_call(
        icnn2_kernel,
        out_shape=jax.ShapeDtypeStruct((1, Bp), jnp.float32),
        grid=(Bp // TB,),
        in_specs=[
            pl.BlockSpec((1, TB), lambda i: (0, i)),       # y tile (batch on lanes)
            pl.BlockSpec((H, 1), lambda i: (0, 0)),        # fused weight, resident
            pl.BlockSpec((H, 1), lambda i: (0, 0)),        # fused bias,  resident
        ],
        out_specs=pl.BlockSpec((1, TB), lambda i: (0, i)),
        compiler_params=pltpu.CompilerParams(
            dimension_semantics=("parallel",)),            # shard batch on v7x 2x TC
    )(y_p, wtot, btot)

    return out[0, :B]                                      # (B,)


def icnn2_reference(y, W0, b0, W1, Wy1, by1):
    """Unfused reference matching the PyTorch module exactly."""
    y2 = jnp.asarray(y, jnp.float32).reshape(-1, 1)        # (B, 1)
    z1 = y2 @ W0.T + b0                                    # (B, H)
    zz = z1 @ W1.T                                         # (B, H)
    lin_y1 = y2 * Wy1[0, 0] + by1[0]                       # (B, 1)
    z = jax.nn.softplus(zz + lin_y1)                       # (B, H)
    return jnp.sum(z, axis=1)                              # (B,)


if __name__ == "__main__":
    hidden_num = 6
    B = 8

    key = jax.random.PRNGKey(0)
    k_y, k_w0, k_b0, k_w1, k_wy1, k_by1 = jax.random.split(key, 6)

    # Deterministic parameter init (shapes follow ICNN2.__init__, PyTorch layout).
    W0 = jax.random.uniform(k_w0, (hidden_num, 1), jnp.float32, -1.0, 1.0)   # linear_y0.weight
    b0 = jax.random.uniform(k_b0, (hidden_num,), jnp.float32, -1.0, 1.0)     # linear_y0.bias
    W1 = jax.random.uniform(k_w1, (hidden_num, hidden_num), jnp.float32,
                            0.01, 4.0)                                        # linear_z1.weight
    Wy1 = jax.random.uniform(k_wy1, (1, 1), jnp.float32, -1.0, 1.0)           # linear_y1.weight
    by1 = jax.random.uniform(k_by1, (1,), jnp.float32, -1.0, 1.0)             # linear_y1.bias

    # Input y: (B, 1)
    y = jax.random.normal(k_y, (B, 1), jnp.float32)

    out = icnn2_forward(y, W0, b0, W1, Wy1, by1)
    jax.block_until_ready(out)

    ref = icnn2_reference(y, W0, b0, W1, Wy1, by1)
    assert out.shape == (B,)
    assert jnp.allclose(out, ref, rtol=1e-5, atol=1e-5), (out, ref)

    print("KERNEL_OK")
</pallas_src>

<mosaic_0001>
module attributes {stable_mosaic.version = 11 : i64} {
  func.func @icnn2_kernel(%arg0: i32, %arg1: memref<1x128xf32, #tpu.memory_space<vmem>>, %arg2: memref<6x1xf32, #tpu.memory_space<vmem>>, %arg3: memref<6x1xf32, #tpu.memory_space<vmem>>, %arg4: memref<1x128xf32, #tpu.memory_space<vmem>>) attributes {dimension_semantics = [#tpu.dimension_semantics<parallel>], iteration_bounds = array<i64: 1>, scalar_prefetch = 0 : i64, scratch_operands = 0 : i64, tpu.core_type = #tpu.core_type<tc>, window_params = [{transform_indices = @transform_0, window_bounds = array<i64: 1, 128>}, {pipeline_mode = #tpu.pipeline_mode<synchronous>, transform_indices = @transform_1, window_bounds = array<i64: 6, 1>}, {pipeline_mode = #tpu.pipeline_mode<synchronous>, transform_indices = @transform_2, window_bounds = array<i64: 6, 1>}, {transform_indices = @transform_3, window_bounds = array<i64: 1, 128>}]} {
    %c0 = arith.constant 0 : index
    %c0_0 = arith.constant 0 : index
    %0 = vector.load %arg1[%c0, %c0_0] : memref<1x128xf32, #tpu.memory_space<vmem>>, vector<1x128xf32>
    %c0_1 = arith.constant 0 : index
    %c0_2 = arith.constant 0 : index
    %1 = vector.load %arg2[%c0_1, %c0_2] : memref<6x1xf32, #tpu.memory_space<vmem>>, vector<6x1xf32>
    %c0_3 = arith.constant 0 : index
    %c0_4 = arith.constant 0 : index
    %2 = vector.load %arg3[%c0_3, %c0_4] : memref<6x1xf32, #tpu.memory_space<vmem>>, vector<6x1xf32>
    %3 = vector.broadcast %1 : vector<6x1xf32> to vector<6x128xf32>
    %4 = vector.broadcast %0 : vector<1x128xf32> to vector<6x128xf32>
    %5 = arith.mulf %3, %4 : vector<6x128xf32>
    %6 = vector.broadcast %2 : vector<6x1xf32> to vector<6x128xf32>
    %7 = arith.addf %5, %6 : vector<6x128xf32>
    %cst = arith.constant 0.000000e+00 : f32
    %8 = vector.broadcast %cst : f32 to vector<6x128xf32>
    %9 = arith.maximumf %7, %8 : vector<6x128xf32>
    %10 = math.absf %7 : vector<6x128xf32>
    %cst_5 = arith.constant 0.000000e+00 : f32
    %11 = vector.broadcast %cst_5 : f32 to vector<6x128xf32>
    %12 = arith.subf %11, %10 : vector<6x128xf32>
    %13 = math.exp %12 : vector<6x128xf32>
    %14 = math.log1p %13 : vector<6x128xf32>
    %15 = arith.addf %9, %14 : vector<6x128xf32>
    %cst_6 = arith.constant dense<0.000000e+00> : vector<128xf32>
    %16 = vector.multi_reduction <add>, %15, %cst_6 [0] : vector<6x128xf32> to vector<128xf32>
    %17 = vector.shape_cast %16 : vector<128xf32> to vector<1x128xf32>
    %c0_7 = arith.constant 0 : index
    %c0_8 = arith.constant 0 : index
    %18 = vector.load %arg4[%c0_7, %c0_8] : memref<1x128xf32, #tpu.memory_space<vmem>>, vector<1x128xf32>
    tpu.vector_store %arg4[%c0_7, %c0_8], %17 {strides = array<i32>} : memref<1x128xf32, #tpu.memory_space<vmem>>, vector<1x128xf32>,
    return
  }
  func.func @transform_0(%arg0: i32) -> (i32, i32) {
    %c0_i32 = arith.constant 0 : i32
    %c0_i32_0 = arith.constant 0 : i32
    return %c0_i32, %arg0 : i32, i32
  }
  func.func @transform_1(%arg0: i32) -> (i32, i32) {
    %c0_i32 = arith.constant 0 : i32
    %c0_i32_0 = arith.constant 0 : i32
    %c0_i32_1 = arith.constant 0 : i32
    return %c0_i32, %c0_i32_0 : i32, i32
  }
  func.func @transform_2(%arg0: i32) -> (i32, i32) {
    %c0_i32 = arith.constant 0 : i32
    %c0_i32_0 = arith.constant 0 : i32
    %c0_i32_1 = arith.constant 0 : i32
    return %c0_i32, %c0_i32_0 : i32, i32
  }
  func.func @transform_3(%arg0: i32) -> (i32, i32) {
    %c0_i32 = arith.constant 0 : i32
    %c0_i32_0 = arith.constant 0 : i32
    return %c0_i32, %arg0 : i32, i32
  }
}

</mosaic_0001>

<bundles_post_ra>
// kernel: tpu_custom_call.1
= control target key start
LH: loop header
LB: loop body
LE: loop exit
PB: predicated region body
PF: predicated region fallthrough
CT: control target
= control target key end

     0   :  { %v107_v1 = vmov 0   ;;  %s141_s0 = inlined_call_operand.vmem [shape: f32[1,128], index: 0, kind: input, shape index: {}]   ;;  %s142_s1 = inlined_call_operand.vmem [shape: f32[6,1], index: 1, kind: input, shape index: {}]   ;;  %s143_s2 = inlined_call_operand.vmem [shape: f32[6,1], index: 2, kind: input, shape index: {}]   ;;  %s144_s3 = inlined_call_operand.hbm [shape: f32[1,128], index: 3, kind: output, shape index: {}]  }
   0x1   :  { %v16_v0 = vld [vmem:[%s142_s1] sm:$0x3f]  ;;  %75 = vset.pattern.permute.xlu0 %v107_v1 }
   0x2   :  { %8 = vsyncpa [#allocation3], 0  ;;  %20 = vperm.xlu0 %75, %v16_v0   ;;  %v17_v2 = vld [vmem:[%s143_s2] sm:$0x3f]  ;;  %vm48_vm1 = vcmask 1045504   ;;  %s64_s19 = sshll.u32 %s144_s3, 4  ;;  %s65_s19 = int_to_ptr.hbm [resolvable:$true] %s64_s19 }
   0x3   :  { %v76_v4 = vld [vmem:[%s141_s0] ss:$0 sm:$0xff]  ;;  %s108_s0 = smov [#allocation2]  }
   0x4   :  { %s62_s1 = sshll.u32 %s108_s0, 4  ;;  %s63_s1 = int_to_ptr.vmem [resolvable:$true] %s62_s1 }
   0xa   :  { %29 = vperm.xlu0 %75, %v17_v2  }
  0x74   :  { %v21_v3 = vpop.permute.xlu0 %20 }
  0x75   :  { %v26_v5 = vmul.f32 %v76_v4, %v21_v3 }
  0x7c   :  { %v30_v6 = vpop.permute.xlu0 %29 }
  0x7d   :  { %v32_v7 = vadd.f32 %v30_v6, %v26_v5 }
  0x7f   :  { %v34_v8 = vand.u32 2147483647, %v32_v7  ;;  %v33_v19 = vmax.f32 %v32_v7, 0.0 }
  0x81   :  { %v35_v9 = vsub.f32 0.0, %v34_v8 }
  0x83   :  { %v36_v10 = vmul.f32 1.442695, %v35_v9 }
  0x85   :  { %77 = vpow2.f32 %v36_v10 }
  0x8b   :  { %v78_v11 = vpop.eup %77 }
  0x8c   :  { %v38_v12 = vadd.f32 1.0, %v78_v11  ;;  %v41_v13 = vmul.f32 -0.5, %v78_v11  ;;  %v44_v15 = vand.u32 2147483647, %v78_v11 }
  0x8e   :  { %79 = vlog2.f32 %v38_v12  ;;  %v42_v14 = vadd.f32 1.0, %v41_v13  ;;  %vm45_vm0 = vcmp.lt.f32.partialorder %v44_v15, 0.0004427343 }
  0x90   :  { %v43_v18 = vmul.f32 %v78_v11, %v42_v14 }
  0x94   :  { %v80_v16 = vpop.eup %79 }
  0x95   :  { %v40_v17 = vmul.f32 0.6931472, %v80_v16 }
  0x97   :  { %v46_v20 = vsel %vm45_vm0, %v43_v18, %v40_v17 }
  0x98   :  { %v47_v21 = vadd.f32 %v46_v20, %v33_v19 }
  0x9a   :  { %v49_v22 = vsel %vm48_vm1, %v47_v21, 0.0 }
  0x9b   :  { %v50_v23 = vrot.slane %v49_v22, 4 }
  0x9d   :  { %v51_v24 = vadd.f32 %v50_v23, %v49_v22 }
  0x9f   :  { %v52_v25 = vrot.slane %v51_v24, 2 }
  0xa1   :  { %v53_v26 = vadd.f32 %v52_v25, %v51_v24 }
  0xa3   :  { %v54_v27 = vrot.slane %v53_v26, 1 }
  0xa5   :  { %v55_v28 = vadd.f32 %v54_v27, %v53_v26 }
  0xa7   :  { %56 = vst [vmem:[#allocation2] sm:$0x1] %v55_v28 }
  0xa8   :  { %67 = dma.vmem_to_hbm [thread:$0]  %s63_s1, 16, %s65_s19, [#allocation3]  }
  0xa9   :  { %105 = dma.done.wait [#allocation3], 16  }
  0xaa   :  { %106 = vsyncadd [#allocation3], 4294967280 }
  0xab   :  { %72 = vsyncpa [#allocation3], 1 }

</bundles_post_ra>
